<compile_context>
chip_gen: v5e
topology: v5e:2x2
jax: 0.10.0
libtpu: 0.0.40
codegen_flags: <defaults>
</compile_context>

<pallas_src>
import functools

import jax
import jax.numpy as jnp
from jax import lax
from jax.experimental import pallas as pl
from jax.experimental.pallas import tpu as pltpu


LANE = 128


def _gcnn_kernel(news_len,
                 x_ref,                             # (tile_rows, in_ch) pipelined
                 news_idx_ref, stock_idx_ref,       # (1, E_pad) int32, resident
                 w_in_ref, b_in_ref,
                 w_mid_ref, b_mid_ref,
                 w_out_ref, b_out_ref,              # out-proj padded to 128 lanes
                 o_ref,                             # (stocks_len, out_pad) resident
                 m_scr):                            # VMEM scratch (stocks_len, hidden)
    i = pl.program_id(0)
    tile_rows = x_ref.shape[0]
    stocks_len = m_scr.shape[0]

    # ---- stage 1 (per row tile, auto-pipelined): m = ReLU(x @ W_in + b_in) ----
    m_tile = jnp.dot(x_ref[...], w_in_ref[...], preferred_element_type=jnp.float32)
    m_tile = jnp.maximum(m_tile + b_in_ref[...], 0.0)
    row0 = pl.multiple_of(i * tile_rows, tile_rows)
    m_scr[pl.ds(row0, tile_rows), :] = m_tile

    # ---- stages 2-5 run once, after the last row tile has been staged ----
    @pl.when(i == pl.num_programs(0) - 1)
    def _():
        e_pad = news_idx_ref.shape[1]
        ids_n = news_idx_ref[...]                   # (1, E_pad)
        ids_s = stock_idx_ref[...]                  # (1, E_pad)

        # One-hot edge incidence (padded edges use id = -1 -> all-zero column).
        oh_n = (lax.broadcasted_iota(jnp.int32, (news_len, e_pad), 0) == ids_n
                ).astype(jnp.float32)               # (N, E)
        oh_s = (lax.broadcasted_iota(jnp.int32, (stocks_len, e_pad), 0) == ids_s
                ).astype(jnp.float32)               # (S, E)

        # Adjacency counts A[n, s] = #edges between news n and stock s (MXU).
        adj = lax.dot_general(oh_n, oh_s, (((1,), (1,)), ((), ())),
                              preferred_element_type=jnp.float32)     # (N, S)

        # stock -> news "sum" aggregation (SimpleConv over back_edge), mid_layer.
        c = jnp.dot(adj, m_scr[...], preferred_element_type=jnp.float32)   # (N, H)
        c = jnp.dot(c, w_mid_ref[...], preferred_element_type=jnp.float32)
        c = jnp.maximum(c + b_mid_ref[...], 0.0)

        # news -> stock "sum" aggregation: m2 = A^T @ c (lhs-transposed matmul).
        m2 = lax.dot_general(adj, c, (((0,), (0,)), ((), ())),
                             preferred_element_type=jnp.float32)      # (S, H)

        # out_layer: Linear + ReLU, lane-dense (128-wide padded) store.
        out = jnp.dot(m2, w_out_ref[...], preferred_element_type=jnp.float32)
        o_ref[...] = jnp.maximum(out + b_out_ref[...], 0.0).astype(o_ref.dtype)


def _pick_row_tile(n):
    for t in (256, 128, 64, 32, 16, 8):
        if n % t == 0:
            return t
    return n  # fall back to a single full-height block


def gcnn_forward(x, edge_index, params, num_stocks, num_news):
    """x: (stocks_len, in_channel) f32.
    edge_index: (2, E) int32, row 0 = news (source), row 1 = stock (target)
    (PyG source_to_target convention used by news_to_stock_propogation)."""
    stocks_len, in_ch = x.shape
    batch_size = stocks_len // num_stocks
    news_len = batch_size * num_news

    w_in, b_in, w_mid, b_mid, w_out, b_out = params
    hidden = w_in.shape[1]
    out_channel = w_out.shape[1]

    # Lane-dense output: pad the out projection to a multiple of 128 lanes.
    out_pad = ((out_channel + LANE - 1) // LANE) * LANE
    w_out_p = jnp.zeros((hidden, out_pad), jnp.float32).at[:, :out_channel].set(w_out)
    b_out_p = jnp.zeros((1, out_pad), jnp.float32).at[:, :out_channel].set(b_out)

    # Edge list, lane-padded to a multiple of 128 with -1 sentinels.
    n_edges = edge_index.shape[1]
    e_pad = max(((n_edges + LANE - 1) // LANE) * LANE, LANE)
    news_idx = jnp.full((1, e_pad), -1, jnp.int32).at[0, :n_edges].set(
        edge_index[0].astype(jnp.int32))
    stock_idx = jnp.full((1, e_pad), -1, jnp.int32).at[0, :n_edges].set(
        edge_index[1].astype(jnp.int32))

    tile_rows = _pick_row_tile(stocks_len)
    grid = (stocks_len // tile_rows,)

    # VMEM budget: double-buffered x tiles + resident weights/edges/output +
    # staged scratch + one-hot / adjacency temporaries of the final step.
    vmem_bytes = 4 * (
        2 * tile_rows * in_ch                                  # x tiles (double buffer)
        + 2 * 8 * e_pad                                        # edge-id vectors (sublane-padded)
        + (news_len + stocks_len) * e_pad                      # one-hot temporaries
        + news_len * stocks_len                                # adjacency
        + stocks_len * hidden + news_len * hidden              # scratch + mid temp
        + 2 * stocks_len * out_pad                             # resident output
        + 2 * (w_in.size + b_in.size + w_mid.size + b_mid.size
               + w_out_p.size + b_out_p.size)
    )
    vmem_limit = int(min(max(vmem_bytes + (8 << 20), 16 << 20), 64 << 20))

    grid_spec = pltpu.PrefetchScalarGridSpec(
        num_scalar_prefetch=0,
        grid=grid,
        in_specs=[
            pl.BlockSpec((tile_rows, in_ch), lambda i: (i, 0)),
            pl.BlockSpec((1, e_pad), lambda i: (0, 0)),
            pl.BlockSpec((1, e_pad), lambda i: (0, 0)),
            pl.BlockSpec(w_in.shape, lambda i: (0, 0)),
            pl.BlockSpec(b_in.shape, lambda i: (0, 0)),
            pl.BlockSpec(w_mid.shape, lambda i: (0, 0)),
            pl.BlockSpec(b_mid.shape, lambda i: (0, 0)),
            pl.BlockSpec(w_out_p.shape, lambda i: (0, 0)),
            pl.BlockSpec(b_out_p.shape, lambda i: (0, 0)),
        ],
        out_specs=pl.BlockSpec((stocks_len, out_pad), lambda i: (0, 0)),
        scratch_shapes=[
            pltpu.VMEM((stocks_len, hidden), jnp.float32),     # staged in_layer output
        ],
    )

    out_padded = pl.pallas_call(
        functools.partial(_gcnn_kernel, news_len),
        out_shape=jax.ShapeDtypeStruct((stocks_len, out_pad), jnp.float32),
        grid_spec=grid_spec,
        compiler_params=pltpu.CompilerParams(
            # The row-tile axis carries staged VMEM scratch into the final
            # aggregation step, so it must stay sequential ("arbitrary").
            dimension_semantics=("arbitrary",),
            vmem_limit_bytes=vmem_limit,
        ),
    )(x, news_idx, stock_idx, w_in, b_in, w_mid, b_mid, w_out_p, b_out_p)

    return out_padded[:, :out_channel]


def gcnn_reference(x, edge_index, params, num_stocks, num_news):
    stocks_len = x.shape[0]
    batch_size = stocks_len // num_stocks
    news_len = batch_size * num_news
    w_in, b_in, w_mid, b_mid, w_out, b_out = params

    m = jnp.maximum(x @ w_in + b_in, 0.0)
    center_m = jnp.zeros((news_len, m.shape[1]), jnp.float32).at[edge_index[0]].add(
        m[edge_index[1]])
    center_m = jnp.maximum(center_m @ w_mid + b_mid, 0.0)
    m2 = jnp.zeros((stocks_len, center_m.shape[1]), jnp.float32).at[edge_index[1]].add(
        center_m[edge_index[0]])
    return jnp.maximum(m2 @ w_out + b_out, 0.0)


if __name__ == "__main__":
    # Module hyper-params (ignore_in_channel=False, to_center=to_local="sum").
    num_stocks, num_news = 8, 4
    batch_size = 2
    in_channel, hidden_channel, out_channel = 8, 32, 16

    stocks_len = batch_size * num_stocks      # 16
    news_len = batch_size * num_news          # 8
    num_edges = 32

    key = jax.random.PRNGKey(0)
    k_x, k_e0, k_e1, k1, k2, k3, k4, k5, k6 = jax.random.split(key, 9)

    # Inputs
    x = jax.random.normal(k_x, (stocks_len, in_channel), jnp.float32)
    edge_index = jnp.stack([
        jax.random.randint(k_e0, (num_edges,), 0, news_len),    # source: news
        jax.random.randint(k_e1, (num_edges,), 0, stocks_len),  # target: stocks
    ]).astype(jnp.int32)

    # Deterministic parameter init (Linear weights stored as (in, out); biases (1, out)).
    def init_linear(kw, kb, fan_in, fan_out):
        bound = 1.0 / jnp.sqrt(fan_in)
        w = jax.random.uniform(kw, (fan_in, fan_out), jnp.float32, -bound, bound)
        b = jax.random.uniform(kb, (1, fan_out), jnp.float32, -bound, bound)
        return w, b

    w_in, b_in = init_linear(k1, k2, in_channel, hidden_channel)
    w_mid, b_mid = init_linear(k3, k4, hidden_channel, hidden_channel)
    w_out, b_out = init_linear(k5, k6, hidden_channel, out_channel)
    params = (w_in, b_in, w_mid, b_mid, w_out, b_out)

    out = gcnn_forward(x, edge_index, params, num_stocks, num_news)
    out = jax.block_until_ready(out)

    ref = gcnn_reference(x, edge_index, params, num_stocks, num_news)
    assert out.shape == (stocks_len, out_channel)
    assert jnp.allclose(out, ref, atol=1e-5, rtol=1e-5), "mismatch vs reference"

    print("KERNEL_OK")
</pallas_src>

<mosaic_0001>
module attributes {stable_mosaic.version = 11 : i64} {
  func.func @_gcnn_kernel(%arg0: i32, %arg1: memref<16x8xf32, #tpu.memory_space<vmem>>, %arg2: memref<1x128xi32, #tpu.memory_space<vmem>>, %arg3: memref<1x128xi32, #tpu.memory_space<vmem>>, %arg4: memref<8x32xf32, #tpu.memory_space<vmem>>, %arg5: memref<1x32xf32, #tpu.memory_space<vmem>>, %arg6: memref<32x32xf32, #tpu.memory_space<vmem>>, %arg7: memref<1x32xf32, #tpu.memory_space<vmem>>, %arg8: memref<32x128xf32, #tpu.memory_space<vmem>>, %arg9: memref<1x128xf32, #tpu.memory_space<vmem>>, %arg10: memref<16x128xf32, #tpu.memory_space<vmem>>, %arg11: memref<16x32xf32, #tpu.memory_space<vmem>>) attributes {dimension_semantics = [#tpu.dimension_semantics<arbitrary>], iteration_bounds = array<i64: 1>, scalar_prefetch = 0 : i64, scratch_operands = 1 : i64, tpu.core_type = #tpu.core_type<tc>, window_params = [{transform_indices = @transform_0, window_bounds = array<i64: 16, 8>}, {pipeline_mode = #tpu.pipeline_mode<synchronous>, transform_indices = @transform_1, window_bounds = array<i64: 1, 128>}, {pipeline_mode = #tpu.pipeline_mode<synchronous>, transform_indices = @transform_2, window_bounds = array<i64: 1, 128>}, {pipeline_mode = #tpu.pipeline_mode<synchronous>, transform_indices = @transform_3, window_bounds = array<i64: 8, 32>}, {pipeline_mode = #tpu.pipeline_mode<synchronous>, transform_indices = @transform_4, window_bounds = array<i64: 1, 32>}, {pipeline_mode = #tpu.pipeline_mode<synchronous>, transform_indices = @transform_5, window_bounds = array<i64: 32, 32>}, {pipeline_mode = #tpu.pipeline_mode<synchronous>, transform_indices = @transform_6, window_bounds = array<i64: 1, 32>}, {pipeline_mode = #tpu.pipeline_mode<synchronous>, transform_indices = @transform_7, window_bounds = array<i64: 32, 128>}, {pipeline_mode = #tpu.pipeline_mode<synchronous>, transform_indices = @transform_8, window_bounds = array<i64: 1, 128>}, {pipeline_mode = #tpu.pipeline_mode<synchronous>, transform_indices = @transform_9, window_bounds = array<i64: 16, 128>}]} {
    %c0 = arith.constant 0 : index
    %c0_0 = arith.constant 0 : index
    %0 = vector.load %arg1[%c0, %c0_0] : memref<16x8xf32, #tpu.memory_space<vmem>>, vector<16x8xf32>
    %c0_1 = arith.constant 0 : index
    %c0_2 = arith.constant 0 : index
    %1 = vector.load %arg4[%c0_1, %c0_2] : memref<8x32xf32, #tpu.memory_space<vmem>>, vector<8x32xf32>
    %cst = arith.constant dense<0.000000e+00> : vector<16x32xf32>
    %2 = tpu.matmul %0, %1, %cst {dimension_numbers = #tpu.dot_dimension_numbers<[1], [0], [0], [1], [0, 0, 1, 1], [], []>} : vector<16x8xf32>, vector<8x32xf32>, vector<16x32xf32> -> vector<16x32xf32>
    %c0_3 = arith.constant 0 : index
    %c0_4 = arith.constant 0 : index
    %3 = vector.load %arg5[%c0_3, %c0_4] : memref<1x32xf32, #tpu.memory_space<vmem>>, vector<1x32xf32>
    %4 = vector.broadcast %3 : vector<1x32xf32> to vector<16x32xf32>
    %5 = arith.addf %2, %4 : vector<16x32xf32>
    %cst_5 = arith.constant 0.000000e+00 : f32
    %6 = vector.broadcast %cst_5 : f32 to vector<16x32xf32>
    %7 = arith.maximumf %5, %6 : vector<16x32xf32>
    %c16_i32 = arith.constant 16 : i32
    %8 = arith.muli %arg0, %c16_i32 : i32
    %9 = tpu.assume_multiple %8, 16 : i32
    %10 = arith.index_cast %9 : i32 to index
    %c0_6 = arith.constant 0 : index
    %11 = vector.load %arg11[%10, %c0_6] : memref<16x32xf32, #tpu.memory_space<vmem>>, vector<16x32xf32>
    tpu.vector_store %arg11[%10, %c0_6], %7 {strides = array<i32>} : memref<16x32xf32, #tpu.memory_space<vmem>>, vector<16x32xf32>,
    %c0_i32 = arith.constant 0 : i32
    %12 = arith.cmpi eq, %arg0, %c0_i32 : i32
    %13 = arith.extui %12 : i1 to i32
    %c0_i32_7 = arith.constant 0 : i32
    %14 = arith.cmpi ne, %13, %c0_i32_7 : i32
    scf.if %14 {
      %c0_8 = arith.constant 0 : index
      %c0_9 = arith.constant 0 : index
      %15 = vector.load %arg2[%c0_8, %c0_9] : memref<1x128xi32, #tpu.memory_space<vmem>>, vector<1x128xi32>
      %c0_10 = arith.constant 0 : index
      %c0_11 = arith.constant 0 : index
      %16 = vector.load %arg3[%c0_10, %c0_11] : memref<1x128xi32, #tpu.memory_space<vmem>>, vector<1x128xi32>
      %17 = tpu.iota {dimensions = array<i32: 0>} : vector<8x128xi32>
      %18 = vector.broadcast %15 : vector<1x128xi32> to vector<8x128xi32>
      %19 = arith.cmpi eq, %17, %18 : vector<8x128xi32>
      %20 = arith.extui %19 : vector<8x128xi1> to vector<8x128xi32>
      %21 = arith.sitofp %20 : vector<8x128xi32> to vector<8x128xf32>
      %22 = tpu.iota {dimensions = array<i32: 0>} : vector<16x128xi32>
      %23 = vector.broadcast %16 : vector<1x128xi32> to vector<16x128xi32>
      %24 = arith.cmpi eq, %22, %23 : vector<16x128xi32>
      %25 = arith.extui %24 : vector<16x128xi1> to vector<16x128xi32>
      %26 = arith.sitofp %25 : vector<16x128xi32> to vector<16x128xf32>
      %cst_12 = arith.constant dense<0.000000e+00> : vector<8x16xf32>
      %27 = tpu.matmul %21, %26, %cst_12 {dimension_numbers = #tpu.dot_dimension_numbers<[1], [1], [0], [0], [0, 0, 1, 0], [], []>} : vector<8x128xf32>, vector<16x128xf32>, vector<8x16xf32> -> vector<8x16xf32>
      %c0_13 = arith.constant 0 : index
      %c0_14 = arith.constant 0 : index
      %28 = vector.load %arg11[%c0_13, %c0_14] : memref<16x32xf32, #tpu.memory_space<vmem>>, vector<16x32xf32>
      %cst_15 = arith.constant dense<0.000000e+00> : vector<8x32xf32>
      %29 = tpu.matmul %27, %28, %cst_15 {dimension_numbers = #tpu.dot_dimension_numbers<[1], [0], [0], [1], [0, 0, 1, 1], [], []>} : vector<8x16xf32>, vector<16x32xf32>, vector<8x32xf32> -> vector<8x32xf32>
      %c0_16 = arith.constant 0 : index
      %c0_17 = arith.constant 0 : index
      %30 = vector.load %arg6[%c0_16, %c0_17] : memref<32x32xf32, #tpu.memory_space<vmem>>, vector<32x32xf32>
      %cst_18 = arith.constant dense<0.000000e+00> : vector<8x32xf32>
      %31 = tpu.matmul %29, %30, %cst_18 {dimension_numbers = #tpu.dot_dimension_numbers<[1], [0], [0], [1], [0, 0, 1, 1], [], []>} : vector<8x32xf32>, vector<32x32xf32>, vector<8x32xf32> -> vector<8x32xf32>
      %c0_19 = arith.constant 0 : index
      %c0_20 = arith.constant 0 : index
      %32 = vector.load %arg7[%c0_19, %c0_20] : memref<1x32xf32, #tpu.memory_space<vmem>>, vector<1x32xf32>
      %33 = vector.broadcast %32 : vector<1x32xf32> to vector<8x32xf32>
      %34 = arith.addf %31, %33 : vector<8x32xf32>
      %cst_21 = arith.constant 0.000000e+00 : f32
      %35 = vector.broadcast %cst_21 : f32 to vector<8x32xf32>
      %36 = arith.maximumf %34, %35 : vector<8x32xf32>
      %cst_22 = arith.constant dense<0.000000e+00> : vector<16x32xf32>
      %37 = tpu.matmul %27, %36, %cst_22 {dimension_numbers = #tpu.dot_dimension_numbers<[0], [0], [1], [1], [0, 1, 1, 1], [], []>} : vector<8x16xf32>, vector<8x32xf32>, vector<16x32xf32> -> vector<16x32xf32>
      %c0_23 = arith.constant 0 : index
      %c0_24 = arith.constant 0 : index
      %38 = vector.load %arg8[%c0_23, %c0_24] : memref<32x128xf32, #tpu.memory_space<vmem>>, vector<32x128xf32>
      %cst_25 = arith.constant dense<0.000000e+00> : vector<16x128xf32>
      %39 = tpu.matmul %37, %38, %cst_25 {dimension_numbers = #tpu.dot_dimension_numbers<[1], [0], [0], [1], [0, 0, 1, 1], [], []>} : vector<16x32xf32>, vector<32x128xf32>, vector<16x128xf32> -> vector<16x128xf32>
      %c0_26 = arith.constant 0 : index
      %c0_27 = arith.constant 0 : index
      %40 = vector.load %arg9[%c0_26, %c0_27] : memref<1x128xf32, #tpu.memory_space<vmem>>, vector<1x128xf32>
      %41 = vector.broadcast %40 : vector<1x128xf32> to vector<16x128xf32>
      %42 = arith.addf %39, %41 : vector<16x128xf32>
      %cst_28 = arith.constant 0.000000e+00 : f32
      %43 = vector.broadcast %cst_28 : f32 to vector<16x128xf32>
      %44 = arith.maximumf %42, %43 : vector<16x128xf32>
      %c0_29 = arith.constant 0 : index
      %c0_30 = arith.constant 0 : index
      %45 = vector.load %arg10[%c0_29, %c0_30] : memref<16x128xf32, #tpu.memory_space<vmem>>, vector<16x128xf32>
      tpu.vector_store %arg10[%c0_29, %c0_30], %44 {strides = array<i32>} : memref<16x128xf32, #tpu.memory_space<vmem>>, vector<16x128xf32>,
    } else {
    }
    return
  }
  func.func @transform_0(%arg0: i32) -> (i32, i32) {
    %c0_i32 = arith.constant 0 : i32
    %c0_i32_0 = arith.constant 0 : i32
    return %arg0, %c0_i32 : i32, i32
  }
  func.func @transform_1(%arg0: i32) -> (i32, i32) {
    %c0_i32 = arith.constant 0 : i32
    %c0_i32_0 = arith.constant 0 : i32
    %c0_i32_1 = arith.constant 0 : i32
    return %c0_i32, %c0_i32_0 : i32, i32
  }
  func.func @transform_2(%arg0: i32) -> (i32, i32) {
    %c0_i32 = arith.constant 0 : i32
    %c0_i32_0 = arith.constant 0 : i32
    %c0_i32_1 = arith.constant 0 : i32
    return %c0_i32, %c0_i32_0 : i32, i32
  }
  func.func @transform_3(%arg0: i32) -> (i32, i32) {
    %c0_i32 = arith.constant 0 : i32
    %c0_i32_0 = arith.constant 0 : i32
    %c0_i32_1 = arith.constant 0 : i32
    return %c0_i32, %c0_i32_0 : i32, i32
  }
  func.func @transform_4(%arg0: i32) -> (i32, i32) {
    %c0_i32 = arith.constant 0 : i32
    %c0_i32_0 = arith.constant 0 : i32
    %c0_i32_1 = arith.constant 0 : i32
    return %c0_i32, %c0_i32_0 : i32, i32
  }
  func.func @transform_5(%arg0: i32) -> (i32, i32) {
    %c0_i32 = arith.constant 0 : i32
    %c0_i32_0 = arith.constant 0 : i32
    %c0_i32_1 = arith.constant 0 : i32
    return %c0_i32, %c0_i32_0 : i32, i32
  }
  func.func @transform_6(%arg0: i32) -> (i32, i32) {
    %c0_i32 = arith.constant 0 : i32
    %c0_i32_0 = arith.constant 0 : i32
    %c0_i32_1 = arith.constant 0 : i32
    return %c0_i32, %c0_i32_0 : i32, i32
  }
  func.func @transform_7(%arg0: i32) -> (i32, i32) {
    %c0_i32 = arith.constant 0 : i32
    %c0_i32_0 = arith.constant 0 : i32
    %c0_i32_1 = arith.constant 0 : i32
    return %c0_i32, %c0_i32_0 : i32, i32
  }
  func.func @transform_8(%arg0: i32) -> (i32, i32) {
    %c0_i32 = arith.constant 0 : i32
    %c0_i32_0 = arith.constant 0 : i32
    %c0_i32_1 = arith.constant 0 : i32
    return %c0_i32, %c0_i32_0 : i32, i32
  }
  func.func @transform_9(%arg0: i32) -> (i32, i32) {
    %c0_i32 = arith.constant 0 : i32
    %c0_i32_0 = arith.constant 0 : i32
    %c0_i32_1 = arith.constant 0 : i32
    return %c0_i32, %c0_i32_0 : i32, i32
  }
}

</mosaic_0001>

<bundles_post_ra>
// kernel: tpu_custom_call.1
= control target key start
LH: loop header
LB: loop body
LE: loop exit
PB: predicated region body
PF: predicated region fallthrough
CT: control target
= control target key end

     0   :  { %14 = vsyncpa [#allocation4], 0  ;;  %s540_s0 = inlined_call_operand.vmem [shape: f32[16,8], index: 0, kind: input, shape index: {}]   ;;  %s541_s1 = inlined_call_operand.vmem [shape: s32[1,128], index: 1, kind: input, shape index: {}]   ;;  %s542_s2 = inlined_call_operand.vmem [shape: s32[1,128], index: 2, kind: input, shape index: {}]   ;;  %s543_s3 = inlined_call_operand.vmem [shape: f32[8,32], index: 3, kind: input, shape index: {}]   ;;  %s544_s4 = inlined_call_operand.vmem [shape: f32[1,32], index: 4, kind: input, shape index: {}]   ;;  %s545_s5 = inlined_call_operand.hbm [shape: f32[32,32], index: 5, kind: input, shape index: {}]   ;;  %s546_s6 = inlined_call_operand.vmem [shape: f32[1,32], index: 6, kind: input, shape index: {}]   ;;  %s547_s7 = inlined_call_operand.hbm [shape: f32[32,128], index: 7, kind: input, shape index: {}]   ;;  %s548_s8 = inlined_call_operand.vmem [shape: f32[1,128], index: 8, kind: input, shape index: {}]   ;;  %s549_s9 = inlined_call_operand.hbm [shape: f32[16,128], index: 9, kind: output, shape index: {}]  }
   0x1   :  { %15 = vsyncpa [#allocation7], 0 }
   0x2   :  { %16 = vsyncpa [#allocation5], 0  ;;  %s31_s11 = sshll.u32 %s545_s5, 4  ;;  %s433_s12 = smov [#allocation3]   ;;  %s32_s11 = int_to_ptr.hbm [resolvable:$true] %s31_s11 }
   0x3   :  { %s33_s13 = sshll.u32 %s433_s12, 4  ;;  %s46_s16 = sshll.u32 %s547_s7, 4  ;;  %s34_s13 = int_to_ptr.vmem [resolvable:$true] %s33_s13  ;;  %s47_s16 = int_to_ptr.hbm [resolvable:$true] %s46_s16 }
   0x4   :  { %s434_s17 = smov 128   ;;  %s435_s18 = smov 8  }
   0x5   :  { %39 = dma.hbm_to_vmem [thread:$0]  %s32_s11, 512, %s34_s13, [#allocation4], %s434_s17, %s434_s17, %s435_s18  }
   0x6   :  { %s436_s19 = smov [#allocation6]  }
   0x7   :  { %s48_s20 = sshll.u32 %s436_s19, 4  ;;  %s49_s20 = int_to_ptr.vmem [resolvable:$true] %s48_s20 }
   0x8   :  { %54 = dma.hbm_to_vmem [thread:$0]  %s47_s16, 512, %s49_s20, [#allocation7], %s434_s17, %s434_s17, %s435_s18  }
   0x9   :  { %427 = dma.done.wait [#allocation4], 512  }
   0xa   :  { %428 = vsyncadd [#allocation4], 4294966784 }
   0xb   :  { %429 = dma.done.wait [#allocation7], 512  }
   0xc   :  { %430 = vsyncadd [#allocation7], 4294966784  ;;  %v115_v0 = vlaneseq  ;;  %vm72_vm0 = vcmask 64512   ;;  %v67_v3 = vld [vmem:[%s543_s3] sm:$0xff]  ;;  %v437_v6 = vmov 1.0   ;;  %v66_v8 = vld [vmem:[%s540_s0 + $0x8] sm:$0xff] }
   0xd   :  { %v65_v4 = vld [vmem:[%s540_s0] sm:$0xff]  ;;  %94 = vmatpush.msra.mxu0 %v67_v3  ;;  %v178_v9 = vld [vmem:[#allocation3 + $0x18] sm:$0xff]  ;;  %v176_v11 = vld [vmem:[#allocation3 + $0x8] sm:$0xff]  ;;  %vm106_vm4 = vcmask 261120   ;;  %vm151_vm5 = vcmask 130048   ;;  %s438_s29 = smov [#allocation8]  }
   0xe   :  { %v116_v1 = vshrl.u32 %v115_v0, 7  ;;  %v350_v5 = vld [vmem:[%s542_s2] ss:$0 sm:$0xff]  ;;  %329 = vmatmul.msk.f32.vlgmr.msra.gmra.mxu0 %vm72_vm0, %v65_v4  ;;  %v175_v12 = vld [vmem:[#allocation3] sm:$0xff]  ;;  %v271_v24 = vld [vmem:[#allocation6 + $0x18] sm:$0xff]  ;;  %s313_s30 = sshll.u32 %s438_s29, 4  ;;  %s314_s30 = int_to_ptr.vmem [resolvable:$true] %s313_s30 }
   0xf   :  { %v351_v7 = vld [vmem:[%s541_s1] ss:$0 sm:$0xff]  ;;  %294 = vmatpush.msra.mxu1 %v271_v24  ;;  %v269_v26 = vld [vmem:[#allocation6 + $0x8] sm:$0xff]  ;;  %v268_v33 = vld [vmem:[#allocation6] sm:$0xff]  ;;  %s315_s12 = sshll.u32 %s549_s9, 4  ;;  %s316_s12 = int_to_ptr.hbm [resolvable:$true] %s315_s12 }
  0x10   :  { %v121_v2 = vadd.s32 8, %v116_v1  ;;  %vm123_vm2 = vcmp.eq.s32.totalorder %v116_v1, %v350_v5  ;;  %vm118_vm3 = vcmp.eq.s32.totalorder %v116_v1, %v351_v7  ;;  %v177_v10 = vld [vmem:[#allocation3 + $0x10] sm:$0xff] }
  0x11   :  { %v352_v13 = vld [vmem:[%s544_s4] ss:$0 sm:$0xff] }
  0x12   :  { %vm124_vm1 = vcmp.eq.s32.totalorder %v121_v2, %v350_v5  ;;  %v270_v25 = vld [vmem:[#allocation6 + $0x10] sm:$0xff] }
  0x13   :  { %334 = vmatpush.xpose.msk.msra.mxu3 %vm124_vm1, %v437_v6  ;;  %295 = vmatpush.msra.mxu1 %v270_v25  ;;  %v353_v27 = vld [vmem:[%s546_s6] ss:$0 sm:$0xff] }
  0x14   :  { %v354_v36 = vld [vmem:[%s548_s8] ss:$0 sm:$0xff] }
  0x15   :  { %296 = vmatpush.msra.mxu1 %v269_v26 }
  0x16   :  { %330 = vmatmul.msk.f32.gmra.mxu0 %vm72_vm0, %v66_v8 }
  0x17   :  { %335 = vmatpush.xpose.msk.msra.mxu3 %vm123_vm2, %v437_v6  ;;  %297 = vmatpush.msra.mxu1 %v268_v33 }
  0x1a   :  { %336 = vmatmul.msk.f32.vlgmr.msra.gmra.mxu3 %vm118_vm3, %v437_v6 }
  0x1b   :  { %198 = vmatpush.msrb.mxu3 %v178_v9 }
  0x1d   :  { %199 = vmatpush.msrb.mxu3 %v177_v10 }
  0x1f   :  { %200 = vmatpush.msrb.mxu3 %v176_v11 }
  0x21   :  { %201 = vmatpush.msrb.mxu3 %v175_v12 }
  0x8b   :  { %v96_v14 = vpop.f32.mrf.mxu0 }
  0x8c   :  { %v97_v15 = vadd.f32 %v352_v13, %v96_v14 }
  0x8e   :  { %v102_v16 = vmax.f32 %v97_v15, 0.0 }
  0x90   :  { %107 = vst.msk [vmem:[#allocation2] sm:$0xff] %vm106_vm4, %v102_v16 }
  0x93   :  { %v99_v17 = vpop.f32.mrf.mxu0 }
  0x94   :  { %v100_v18 = vadd.f32 %v352_v13, %v99_v17 }
  0x96   :  { %v103_v19 = vmax.f32 %v100_v18, 0.0 }
  0x97   :  { %v149_v22 = vld [vmem:[#allocation2] sm:$0xff] }
  0x98   :  { %108 = vst.msk [vmem:[#allocation2 + $0x8] sm:$0xff] %vm106_vm4, %v103_v19 }
  0x9d   :  { %v146_v20 = vpop.f32.mrf.mxu3 }
  0x9e   :  { %207 = vxpose.xlu0.b32.start.end [1/1] (short) (narrow) %v146_v20, 16 }
  0x9f   :  { %v150_v21 = vld [vmem:[#allocation2 + $0x8] sm:$0xff] }
  0xa0   :  { %169 = vmatpush.msrb.mxu0 %v150_v21 }
  0xa2   :  { %170 = vmatpush.msrb.mxu0 %v149_v22 }
  0xa3   :  { %337 = vmatmul.msk.f32.vlgmr.msrb.gmra.mxu0 %vm151_vm5, %v146_v20 }
 0x120   :  { %v172_v23 = vpop.f32.mrf.mxu0 }
 0x121   :  { %338 = vmatmul.msk.f32.vlgmr.msrb.gmra.mxu3 %vm106_vm4, %v172_v23 }
 0x142   :  { %v223_v29 = vpop.trf.xlu0 }
 0x14a   :  { %v224_v32 = vpop.trf.xlu0 }
 0x1a4   :  { %v203_v28 = vpop.f32.mrf.mxu3 }
 0x1a5   :  { %v204_v30 = vadd.f32 %v353_v27, %v203_v28 }
 0x1a7   :  { %v206_v31 = vmax.f32 %v204_v30, 0.0 }
 0x1a9   :  { %260 = vmatpush.msra.mxu2 %v206_v31 }
 0x1aa   :  { %339 = vmatmul.msk.f32.vlgmr.msra.gmra.mxu2 %vm72_vm0, %v223_v29 }
 0x1b2   :  { %340 = vmatmul.msk.f32.gmra.mxu2 %vm72_vm0, %v224_v32 }
 0x22d   :  { %v262_v34 = vpop.f32.mrf.mxu2 }
 0x22e   :  { %341 = vmatmul.msk.f32.vlgmr.msra.gmra.mxu1 %vm106_vm4, %v262_v34 }
 0x235   :  { %v265_v35 = vpop.f32.mrf.mxu2 }
 0x236   :  { %342 = vmatmul.msk.f32.gmra.mxu1 %vm106_vm4, %v265_v35 }
 0x2ab   :  { %v299_v37 = vpop.f32.mrf.mxu1 }
 0x2ac   :  { %v300_v38 = vadd.f32 %v354_v36, %v299_v37 }
 0x2ae   :  { %v305_v39 = vmax.f32 %v300_v38, 0.0 }
 0x2b0   :  { %307 = vst [vmem:[#allocation8] sm:$0xff] %v305_v39 }
 0x2b3   :  { %v302_v40 = vpop.f32.mrf.mxu1 }
 0x2b4   :  { %v303_v41 = vadd.f32 %v354_v36, %v302_v40 }
 0x2b6   :  { %v306_v42 = vmax.f32 %v303_v41, 0.0 }
 0x2b8   :  { %308 = vst [vmem:[#allocation8 + $0x8] sm:$0xff] %v306_v42 }
 0x2b9   :  { %321 = dma.vmem_to_hbm [thread:$0]  %s314_s30, 256, %s316_s12, [#allocation5], %s434_s17, %s434_s17, %s435_s18  }
 0x2ba   :  { %431 = dma.done.wait [#allocation5], 256  }
 0x2bb   :  { %432 = vsyncadd [#allocation5], 4294967040 }
 0x2bc   :  { %326 = vsyncpa [#allocation4], 1 }
 0x2bd   :  { %327 = vsyncpa [#allocation7], 1 }
 0x2be   :  { %328 = vsyncpa [#allocation5], 1 }

</bundles_post_ra>
